<compile_context>
chip_gen: v6e
topology: v6e:2x2x1
jax: 0.10.0
libtpu: 0.0.40
codegen_flags: <defaults>
</compile_context>

<pallas_src>
import functools

import jax
import jax.numpy as jnp
from jax.experimental import pallas as pl
from jax.experimental.pallas import tpu as pltpu


def _round_up(n, m):
    return ((n + m - 1) // m) * m


def _sindy_ae_kernel(x_ref, dx_ref, ddx_ref, rmask_ref,
                     we1_ref, be1_ref, we2_ref, be2_ref,
                     wd1_ref, bd1_ref, wd2_ref, bd2_ref,
                     c0_ref, clin_ref, cquad_ref,
                     rec_out_ref, ddx_out_ref, ddz_out_ref,
                     acc_rec, acc_ddx, acc_ddz):
    f32 = jnp.float32
    j = pl.program_id(1)

    @pl.when(j == 0)
    def _():
        acc_rec[...] = jnp.zeros_like(acc_rec)
        acc_ddx[...] = jnp.zeros_like(acc_ddx)
        acc_ddz[...] = jnp.zeros_like(acc_ddz)

    x = x_ref[...]
    dx = dx_ref[...]
    ddx = ddx_ref[...]
    w = rmask_ref[...]                       # (m, 1): 1.0 valid row, 0.0 pad row
    m = x.shape[0]

    We1 = we1_ref[...]; be1 = be1_ref[...]
    We2 = we2_ref[...]; be2 = be2_ref[...]
    Wd1 = wd1_ref[...]; bd1 = bd1_ref[...]
    Wd2 = wd2_ref[...]; bd2 = bd2_ref[...]

    # ---- encoder: batch x / dx / ddx through the shared We1, We2 weights ------
    e1 = jnp.dot(jnp.concatenate([x, dx, ddx], axis=0), We1,
                 preferred_element_type=f32)                    # (3m, H)
    h1 = e1[:m] + be1
    dxW = e1[m:2 * m]
    ddxW = e1[2 * m:]

    a1 = jax.nn.sigmoid(h1)
    d1 = a1 * (1.0 - a1)                     # sigmoid'
    dd1 = d1 * (1.0 - 2.0 * a1)              # sigmoid''
    dz_h = d1 * dxW
    ddz_h = dd1 * dxW * dxW + d1 * ddxW

    e2 = jnp.dot(jnp.concatenate([a1, dz_h, ddz_h], axis=0), We2,
                 preferred_element_type=f32)                    # (3m, Z)
    z = e2[:m] + be2
    dz = e2[m:2 * m]
    ddz = e2[2 * m:]

    # ---- SINDy library fused with predict() -----------------------------------
    # theta = [1, z_i, z_i*z_j (i<=j)];  ddz_pred = theta @ (coeffs * mask).
    # Coefficients are pre-masked and reorganized host-side into:
    #   c0 (1,Z) constant row, clin (Z,Z) linear rows, cquad (Z,Z,Z) with
    #   cquad[a,b,:] = masked coeff row of z_a*z_b for b>=a, else 0.
    zdim = z.shape[1]
    ddz_pred = c0_ref[...] + jnp.dot(z, clin_ref[...], preferred_element_type=f32)
    for a in range(zdim):
        ddz_pred = ddz_pred + z[:, a:a + 1] * jnp.dot(
            z, cquad_ref[a], preferred_element_type=f32)

    # ---- decoder: batch z / dz / ddz_pred through Wd1, (ad, ddx_h) through Wd2
    d1o = jnp.dot(jnp.concatenate([z, dz, ddz_pred], axis=0), Wd1,
                  preferred_element_type=f32)                   # (3m, H)
    hd = d1o[:m] + bd1
    dzp = d1o[m:2 * m]
    ddzpW = d1o[2 * m:]

    ad = jax.nn.sigmoid(hd)
    dD = ad * (1.0 - ad)
    ddD = dD * (1.0 - 2.0 * ad)
    ddx_h = ddD * dzp * dzp + dD * ddzpW
    # NOTE: dx_pred = (dD * dzp) @ Wd2 is computed by the PyTorch forward but is
    # never used in the loss, so it is omitted.

    d2o = jnp.dot(jnp.concatenate([ad, ddx_h], axis=0), Wd2,
                  preferred_element_type=f32)                   # (2m, U)
    x_recon = d2o[:m] + bd2
    ddx_pred = d2o[m:]

    # ---- accumulate per-column squared-error sums (sublane reduce only) -------
    acc_rec[...] += jnp.sum(w * (x_recon - x) ** 2, axis=0, keepdims=True)
    acc_ddx[...] += jnp.sum(w * (ddx_pred - ddx) ** 2, axis=0, keepdims=True)
    acc_ddz[...] += jnp.sum(w * (ddz_pred - ddz) ** 2, axis=0, keepdims=True)

    # ---- finalize only on the last step of the reduction axis -----------------
    @pl.when(j == pl.num_programs(1) - 1)
    def _():
        rec_out_ref[...] = acc_rec[...].reshape(rec_out_ref.shape)
        ddx_out_ref[...] = acc_ddx[...].reshape(ddx_out_ref.shape)
        ddz_out_ref[...] = acc_ddz[...].reshape(ddz_out_ref.shape)


@functools.partial(jax.jit, static_argnames=("tile_m", "num_splits"))
def sindy_ae_o2_forward(x, dx, ddx, lambdas, params, *, tile_m=1024, num_splits=2):
    """Returns (l_recon, l_ddx, l_ddz, l_reg) as float32 scalars."""
    f32 = jnp.float32
    B, T, U = x.shape
    N = B * T

    x2 = x.reshape(N, U).astype(f32)
    dx2 = dx.reshape(N, U).astype(f32)
    ddx2 = ddx.reshape(N, U).astype(f32)

    We1 = params["We1"].astype(f32); be1 = params["be1"].astype(f32)
    We2 = params["We2"].astype(f32); be2 = params["be2"].astype(f32)
    Wd1 = params["Wd1"].astype(f32); bd1 = params["bd1"].astype(f32)
    Wd2 = params["Wd2"].astype(f32); bd2 = params["bd2"].astype(f32)
    coeffs = params["sindy_coefficients"].astype(f32)
    mask = params["threshold_mask"].astype(f32)

    H = We1.shape[1]
    Z = We2.shape[1]
    L = coeffs.shape[0]
    assert L == 1 + Z + Z * (Z + 1) // 2, "library must be const + linear + quadratic"

    # Pre-mask and reorganize SINDy coefficients (tiny one-time work).
    coef_m = coeffs * mask
    c_const = coef_m[0:1, :]                                   # (1, Z)
    c_lin = coef_m[1:1 + Z, :]                                 # (Z, Z)
    c_quad = jnp.zeros((Z, Z, Z), f32)
    k = 1 + Z
    for a in range(Z):
        for b in range(a, Z):
            c_quad = c_quad.at[a, b, :].set(coef_m[k, :])
            k += 1

    # Row tiling: big tiles to amortize per-grid-step overhead; pad rows so the
    # grid is (num_splits, nb) with a row-validity mask for padded rows.
    tile = _round_up(min(tile_m, _round_up(N, 8)), 8)
    n_pad = _round_up(N, num_splits * tile)
    nb = n_pad // (num_splits * tile)
    pad = n_pad - N
    if pad:
        zp = ((0, pad), (0, 0))
        x2 = jnp.pad(x2, zp); dx2 = jnp.pad(dx2, zp); ddx2 = jnp.pad(ddx2, zp)
    rmask = (jnp.arange(n_pad, dtype=jnp.int32) < N).astype(f32).reshape(n_pad, 1)

    row_spec = pl.BlockSpec((tile, U), lambda i, j: (i * nb + j, 0))
    mask_spec = pl.BlockSpec((tile, 1), lambda i, j: (i * nb + j, 0))
    full = lambda shape: pl.BlockSpec(shape, lambda i, j: (0,) * len(shape))

    out_shapes = (
        jax.ShapeDtypeStruct((num_splits, 1, U), f32),   # per-split rec sums
        jax.ShapeDtypeStruct((num_splits, 1, U), f32),   # per-split ddx sums
        jax.ShapeDtypeStruct((num_splits, 1, Z), f32),   # per-split ddz sums
    )
    out_specs = (
        pl.BlockSpec((1, 1, U), lambda i, j: (i, 0, 0)),
        pl.BlockSpec((1, 1, U), lambda i, j: (i, 0, 0)),
        pl.BlockSpec((1, 1, Z), lambda i, j: (i, 0, 0)),
    )

    rec_s, ddxp_s, ddzp_s = pl.pallas_call(
        _sindy_ae_kernel,
        grid=(num_splits, nb),
        in_specs=[
            row_spec, row_spec, row_spec, mask_spec,
            full((U, H)), full((1, H)),       # encoder layer 1
            full((H, Z)), full((1, Z)),       # encoder layer 2
            full((Z, H)), full((1, H)),       # decoder layer 1
            full((H, U)), full((1, U)),       # decoder layer 2
            full((1, Z)), full((Z, Z)), full((Z, Z, Z)),   # SINDy coeff blocks
        ],
        out_specs=out_specs,
        out_shape=out_shapes,
        scratch_shapes=[pltpu.VMEM((1, U), f32),
                        pltpu.VMEM((1, U), f32),
                        pltpu.VMEM((1, Z), f32)],
        compiler_params=pltpu.CompilerParams(
            dimension_semantics=("parallel", "arbitrary"),
            vmem_limit_bytes=32 * 1024 * 1024),
    )(x2, dx2, ddx2, rmask,
      We1, be1, We2, be2, Wd1, bd1, Wd2, bd2,
      c_const, c_lin, c_quad)

    lambdas = lambdas.astype(f32)
    denom_x = jnp.float32(N * U)
    denom_z = jnp.float32(N * Z)
    l_recon = jnp.sum(rec_s) / denom_x
    l_ddx = lambdas[0] * jnp.sum(ddxp_s) / denom_x
    l_ddz = lambdas[1] * jnp.sum(ddzp_s) / denom_z
    l_reg = lambdas[2] * jnp.mean(jnp.abs(coeffs))      # unmasked, as in PyTorch
    return l_recon, l_ddx, l_ddz, l_reg


def _reference_losses(x, dx, ddx, lambdas, params):
    """Pure-JAX reference matching the PyTorch forward (sig nonlinearity, 1 hidden)."""
    f32 = jnp.float32
    B, T, U = x.shape
    N = B * T
    x = x.reshape(N, U).astype(f32)
    dx = dx.reshape(N, U).astype(f32)
    ddx = ddx.reshape(N, U).astype(f32)
    We1, be1 = params["We1"], params["be1"]
    We2, be2 = params["We2"], params["be2"]
    Wd1, bd1 = params["Wd1"], params["bd1"]
    Wd2, bd2 = params["Wd2"], params["bd2"]
    coeffs = params["sindy_coefficients"]
    mask = params["threshold_mask"]
    Z = We2.shape[1]

    a1 = jax.nn.sigmoid(x @ We1 + be1)
    z = a1 @ We2 + be2
    d1 = a1 * (1 - a1); dd1 = d1 * (1 - 2 * a1)
    dxW = dx @ We1; ddxW = ddx @ We1
    dz = (d1 * dxW) @ We2
    ddz = (dd1 * dxW ** 2 + d1 * ddxW) @ We2

    ad = jax.nn.sigmoid(z @ Wd1 + bd1)
    x_recon = ad @ Wd2 + bd2

    cols = [jnp.ones((N, 1), f32)] + [z[:, a:a + 1] for a in range(Z)]
    for a in range(Z):
        for b in range(a, Z):
            cols.append(z[:, a:a + 1] * z[:, b:b + 1])
    theta = jnp.concatenate(cols, axis=1)
    ddz_pred = theta @ (coeffs * mask)

    dD = ad * (1 - ad); ddD = dD * (1 - 2 * ad)
    dzp = dz @ Wd1
    ddx_pred = (ddD * dzp ** 2 + dD * (ddz_pred @ Wd1)) @ Wd2

    l_recon = jnp.mean((x_recon - x) ** 2)
    l_ddx = lambdas[0] * jnp.mean((ddx_pred - ddx) ** 2)
    l_ddz = lambdas[1] * jnp.mean((ddz_pred - ddz) ** 2)
    l_reg = lambdas[2] * jnp.mean(jnp.abs(coeffs))
    return l_recon, l_ddx, l_ddz, l_reg


def init_params(key, u_dim, hidden, z_dim, library_dim):
    """Deterministic synthetic parameter init (shapes match the PyTorch module)."""
    ks = jax.random.split(key, 9)

    def lin(k, fan_in, fan_out):
        bound = 1.0 / jnp.sqrt(fan_in)
        kw, kb = jax.random.split(k)
        w = jax.random.uniform(kw, (fan_in, fan_out), jnp.float32, -bound, bound)
        b = jax.random.uniform(kb, (1, fan_out), jnp.float32, -bound, bound)
        return w, b

    We1, be1 = lin(ks[0], u_dim, hidden)
    We2, be2 = lin(ks[1], hidden, z_dim)
    Wd1, bd1 = lin(ks[2], z_dim, hidden)
    Wd2, bd2 = lin(ks[3], hidden, u_dim)
    xavier_std = jnp.sqrt(2.0 / (library_dim + z_dim))
    coeffs = xavier_std * jax.random.normal(ks[4], (library_dim, z_dim), jnp.float32)
    mask = jnp.ones((library_dim, z_dim), jnp.float32)
    return dict(We1=We1, be1=be1, We2=We2, be2=be2,
                Wd1=Wd1, bd1=bd1, Wd2=Wd2, bd2=bd2,
                sindy_coefficients=coeffs, threshold_mask=mask)


if __name__ == "__main__":
    key = jax.random.PRNGKey(0)
    B, T, U, H, Z = 2, 8, 16, 32, 3            # batch, seq, u_dim, hidden, z_dim
    L = 1 + Z + Z * (Z + 1) // 2               # poly order 2 + constant -> 10

    kx, kdx, kddx, kp = jax.random.split(key, 4)
    x = jax.random.normal(kx, (B, T, U), jnp.float32)
    dx = jax.random.normal(kdx, (B, T, U), jnp.float32)
    ddx = jax.random.normal(kddx, (B, T, U), jnp.float32)
    lambdas = jnp.array([1e-4, 1e-5, 1e-5], jnp.float32)

    params = init_params(kp, U, H, Z, L)

    losses = sindy_ae_o2_forward(x, dx, ddx, lambdas, params)
    losses = jax.block_until_ready(losses)

    ref = _reference_losses(x, dx, ddx, lambdas, params)
    for got, want in zip(losses, ref):
        assert jnp.allclose(got, want, rtol=1e-3, atol=1e-6), (got, want)

    print("KERNEL_OK")
</pallas_src>

<mosaic_0001>
module attributes {stable_mosaic.version = 11 : i64} {
  func.func @_sindy_ae_kernel(%arg0: i32, %arg1: i32, %arg2: memref<16x16xf32, #tpu.memory_space<vmem>>, %arg3: memref<16x16xf32, #tpu.memory_space<vmem>>, %arg4: memref<16x16xf32, #tpu.memory_space<vmem>>, %arg5: memref<16x1xf32, #tpu.memory_space<vmem>>, %arg6: memref<16x32xf32, #tpu.memory_space<vmem>>, %arg7: memref<1x32xf32, #tpu.memory_space<vmem>>, %arg8: memref<32x3xf32, #tpu.memory_space<vmem>>, %arg9: memref<1x3xf32, #tpu.memory_space<vmem>>, %arg10: memref<3x32xf32, #tpu.memory_space<vmem>>, %arg11: memref<1x32xf32, #tpu.memory_space<vmem>>, %arg12: memref<32x16xf32, #tpu.memory_space<vmem>>, %arg13: memref<1x16xf32, #tpu.memory_space<vmem>>, %arg14: memref<1x3xf32, #tpu.memory_space<vmem>>, %arg15: memref<3x3xf32, #tpu.memory_space<vmem>>, %arg16: memref<3x3x3xf32, #tpu.memory_space<vmem>>, %arg17: memref<1x1x16xf32, #tpu.memory_space<vmem>>, %arg18: memref<1x1x16xf32, #tpu.memory_space<vmem>>, %arg19: memref<1x1x3xf32, #tpu.memory_space<vmem>>, %arg20: memref<1x16xf32, #tpu.memory_space<vmem>>, %arg21: memref<1x16xf32, #tpu.memory_space<vmem>>, %arg22: memref<1x3xf32, #tpu.memory_space<vmem>>) attributes {dimension_semantics = [#tpu.dimension_semantics<parallel>, #tpu.dimension_semantics<arbitrary>], iteration_bounds = array<i64: 2, 1>, scalar_prefetch = 0 : i64, scratch_operands = 3 : i64, tpu.core_type = #tpu.core_type<tc>, window_params = [{transform_indices = @transform_0, window_bounds = array<i64: 16, 16>}, {transform_indices = @transform_1, window_bounds = array<i64: 16, 16>}, {transform_indices = @transform_2, window_bounds = array<i64: 16, 16>}, {transform_indices = @transform_3, window_bounds = array<i64: 16, 1>}, {pipeline_mode = #tpu.pipeline_mode<synchronous>, transform_indices = @transform_4, window_bounds = array<i64: 16, 32>}, {pipeline_mode = #tpu.pipeline_mode<synchronous>, transform_indices = @transform_5, window_bounds = array<i64: 1, 32>}, {pipeline_mode = #tpu.pipeline_mode<synchronous>, transform_indices = @transform_6, window_bounds = array<i64: 32, 3>}, {pipeline_mode = #tpu.pipeline_mode<synchronous>, transform_indices = @transform_7, window_bounds = array<i64: 1, 3>}, {pipeline_mode = #tpu.pipeline_mode<synchronous>, transform_indices = @transform_8, window_bounds = array<i64: 3, 32>}, {pipeline_mode = #tpu.pipeline_mode<synchronous>, transform_indices = @transform_9, window_bounds = array<i64: 1, 32>}, {pipeline_mode = #tpu.pipeline_mode<synchronous>, transform_indices = @transform_10, window_bounds = array<i64: 32, 16>}, {pipeline_mode = #tpu.pipeline_mode<synchronous>, transform_indices = @transform_11, window_bounds = array<i64: 1, 16>}, {pipeline_mode = #tpu.pipeline_mode<synchronous>, transform_indices = @transform_12, window_bounds = array<i64: 1, 3>}, {pipeline_mode = #tpu.pipeline_mode<synchronous>, transform_indices = @transform_13, window_bounds = array<i64: 3, 3>}, {pipeline_mode = #tpu.pipeline_mode<synchronous>, transform_indices = @transform_14, window_bounds = array<i64: 3, 3, 3>}, {transform_indices = @transform_15, window_bounds = array<i64: 1, 1, 16>}, {transform_indices = @transform_16, window_bounds = array<i64: 1, 1, 16>}, {transform_indices = @transform_17, window_bounds = array<i64: 1, 1, 3>}]} {
    %c0_i32 = arith.constant 0 : i32
    %0 = arith.cmpi eq, %arg1, %c0_i32 : i32
    %1 = arith.extui %0 : i1 to i32
    %c0_i32_0 = arith.constant 0 : i32
    %2 = arith.cmpi ne, %1, %c0_i32_0 : i32
    scf.if %2 {
      %cst_67 = arith.constant 0.000000e+00 : f32
      %133 = vector.broadcast %cst_67 : f32 to vector<1x16xf32>
      %c0_68 = arith.constant 0 : index
      %c0_69 = arith.constant 0 : index
      %134 = vector.load %arg20[%c0_68, %c0_69] : memref<1x16xf32, #tpu.memory_space<vmem>>, vector<1x16xf32>
      tpu.vector_store %arg20[%c0_68, %c0_69], %133 {strides = array<i32>} : memref<1x16xf32, #tpu.memory_space<vmem>>, vector<1x16xf32>,
      %cst_70 = arith.constant 0.000000e+00 : f32
      %135 = vector.broadcast %cst_70 : f32 to vector<1x16xf32>
      %c0_71 = arith.constant 0 : index
      %c0_72 = arith.constant 0 : index
      %136 = vector.load %arg21[%c0_71, %c0_72] : memref<1x16xf32, #tpu.memory_space<vmem>>, vector<1x16xf32>
      tpu.vector_store %arg21[%c0_71, %c0_72], %135 {strides = array<i32>} : memref<1x16xf32, #tpu.memory_space<vmem>>, vector<1x16xf32>,
      %cst_73 = arith.constant 0.000000e+00 : f32
      %137 = vector.broadcast %cst_73 : f32 to vector<1x3xf32>
      %c0_74 = arith.constant 0 : index
      %c0_75 = arith.constant 0 : index
      %138 = vector.load %arg22[%c0_74, %c0_75] : memref<1x3xf32, #tpu.memory_space<vmem>>, vector<1x3xf32>
      tpu.vector_store %arg22[%c0_74, %c0_75], %137 {strides = array<i32>} : memref<1x3xf32, #tpu.memory_space<vmem>>, vector<1x3xf32>,
    } else {
    }
    %c0 = arith.constant 0 : index
    %c0_1 = arith.constant 0 : index
    %3 = vector.load %arg2[%c0, %c0_1] : memref<16x16xf32, #tpu.memory_space<vmem>>, vector<16x16xf32>
    %c0_2 = arith.constant 0 : index
    %c0_3 = arith.constant 0 : index
    %4 = vector.load %arg3[%c0_2, %c0_3] : memref<16x16xf32, #tpu.memory_space<vmem>>, vector<16x16xf32>
    %c0_4 = arith.constant 0 : index
    %c0_5 = arith.constant 0 : index
    %5 = vector.load %arg4[%c0_4, %c0_5] : memref<16x16xf32, #tpu.memory_space<vmem>>, vector<16x16xf32>
    %c0_6 = arith.constant 0 : index
    %c0_7 = arith.constant 0 : index
    %6 = vector.load %arg5[%c0_6, %c0_7] : memref<16x1xf32, #tpu.memory_space<vmem>>, vector<16x1xf32>
    %c0_8 = arith.constant 0 : index
    %c0_9 = arith.constant 0 : index
    %7 = vector.load %arg6[%c0_8, %c0_9] : memref<16x32xf32, #tpu.memory_space<vmem>>, vector<16x32xf32>
    %c0_10 = arith.constant 0 : index
    %c0_11 = arith.constant 0 : index
    %8 = vector.load %arg7[%c0_10, %c0_11] : memref<1x32xf32, #tpu.memory_space<vmem>>, vector<1x32xf32>
    %c0_12 = arith.constant 0 : index
    %c0_13 = arith.constant 0 : index
    %9 = vector.load %arg8[%c0_12, %c0_13] : memref<32x3xf32, #tpu.memory_space<vmem>>, vector<32x3xf32>
    %c0_14 = arith.constant 0 : index
    %c0_15 = arith.constant 0 : index
    %10 = vector.load %arg9[%c0_14, %c0_15] : memref<1x3xf32, #tpu.memory_space<vmem>>, vector<1x3xf32>
    %c0_16 = arith.constant 0 : index
    %c0_17 = arith.constant 0 : index
    %11 = vector.load %arg10[%c0_16, %c0_17] : memref<3x32xf32, #tpu.memory_space<vmem>>, vector<3x32xf32>
    %c0_18 = arith.constant 0 : index
    %c0_19 = arith.constant 0 : index
    %12 = vector.load %arg11[%c0_18, %c0_19] : memref<1x32xf32, #tpu.memory_space<vmem>>, vector<1x32xf32>
    %c0_20 = arith.constant 0 : index
    %c0_21 = arith.constant 0 : index
    %13 = vector.load %arg12[%c0_20, %c0_21] : memref<32x16xf32, #tpu.memory_space<vmem>>, vector<32x16xf32>
    %c0_22 = arith.constant 0 : index
    %c0_23 = arith.constant 0 : index
    %14 = vector.load %arg13[%c0_22, %c0_23] : memref<1x16xf32, #tpu.memory_space<vmem>>, vector<1x16xf32>
    %15 = tpu.concatenate %3, %4, %5 in 0 : vector<16x16xf32>, vector<16x16xf32>, vector<16x16xf32> -> vector<48x16xf32>
    %cst = arith.constant dense<0.000000e+00> : vector<48x32xf32>
    %16 = tpu.matmul %15, %7, %cst {dimension_numbers = #tpu.dot_dimension_numbers<[1], [0], [0], [1], [0, 0, 1, 1], [], []>} : vector<48x16xf32>, vector<16x32xf32>, vector<48x32xf32> -> vector<48x32xf32>
    %17 = vector.extract_strided_slice %16 {offsets = [0, 0], sizes = [16, 32], strides = [1, 1]} : vector<48x32xf32> to vector<16x32xf32>
    %18 = vector.broadcast %8 : vector<1x32xf32> to vector<16x32xf32>
    %19 = arith.addf %17, %18 : vector<16x32xf32>
    %20 = vector.extract_strided_slice %16 {offsets = [16, 0], sizes = [16, 32], strides = [1, 1]} : vector<48x32xf32> to vector<16x32xf32>
    %21 = vector.extract_strided_slice %16 {offsets = [32, 0], sizes = [16, 32], strides = [1, 1]} : vector<48x32xf32> to vector<16x32xf32>
    %22 = arith.negf %19 : vector<16x32xf32>
    %23 = math.exp %22 : vector<16x32xf32>
    %cst_24 = arith.constant 1.000000e+00 : f32
    %24 = vector.broadcast %cst_24 : f32 to vector<16x32xf32>
    %25 = arith.addf %24, %23 : vector<16x32xf32>
    %26 = arith.divf %24, %25 : vector<16x32xf32>
    %cst_25 = arith.constant 1.000000e+00 : f32
    %27 = vector.broadcast %cst_25 : f32 to vector<16x32xf32>
    %28 = arith.subf %27, %26 : vector<16x32xf32>
    %29 = arith.mulf %26, %28 : vector<16x32xf32>
    %cst_26 = arith.constant 2.000000e+00 : f32
    %30 = vector.broadcast %cst_26 : f32 to vector<16x32xf32>
    %31 = arith.mulf %30, %26 : vector<16x32xf32>
    %cst_27 = arith.constant 1.000000e+00 : f32
    %32 = vector.broadcast %cst_27 : f32 to vector<16x32xf32>
    %33 = arith.subf %32, %31 : vector<16x32xf32>
    %34 = arith.mulf %29, %33 : vector<16x32xf32>
    %35 = arith.mulf %29, %20 : vector<16x32xf32>
    %36 = arith.mulf %34, %20 : vector<16x32xf32>
    %37 = arith.mulf %36, %20 : vector<16x32xf32>
    %38 = arith.mulf %29, %21 : vector<16x32xf32>
    %39 = arith.addf %37, %38 : vector<16x32xf32>
    %40 = tpu.concatenate %26, %35, %39 in 0 : vector<16x32xf32>, vector<16x32xf32>, vector<16x32xf32> -> vector<48x32xf32>
    %cst_28 = arith.constant dense<0.000000e+00> : vector<48x3xf32>
    %41 = tpu.matmul %40, %9, %cst_28 {dimension_numbers = #tpu.dot_dimension_numbers<[1], [0], [0], [1], [0, 0, 1, 1], [], []>} : vector<48x32xf32>, vector<32x3xf32>, vector<48x3xf32> -> vector<48x3xf32>
    %42 = vector.extract_strided_slice %41 {offsets = [0, 0], sizes = [16, 3], strides = [1, 1]} : vector<48x3xf32> to vector<16x3xf32>
    %43 = vector.broadcast %10 : vector<1x3xf32> to vector<16x3xf32>
    %44 = arith.addf %42, %43 : vector<16x3xf32>
    %45 = vector.extract_strided_slice %41 {offsets = [16, 0], sizes = [16, 3], strides = [1, 1]} : vector<48x3xf32> to vector<16x3xf32>
    %46 = vector.extract_strided_slice %41 {offsets = [32, 0], sizes = [16, 3], strides = [1, 1]} : vector<48x3xf32> to vector<16x3xf32>
    %c0_29 = arith.constant 0 : index
    %c0_30 = arith.constant 0 : index
    %47 = vector.load %arg14[%c0_29, %c0_30] : memref<1x3xf32, #tpu.memory_space<vmem>>, vector<1x3xf32>
    %c0_31 = arith.constant 0 : index
    %c0_32 = arith.constant 0 : index
    %48 = vector.load %arg15[%c0_31, %c0_32] : memref<3x3xf32, #tpu.memory_space<vmem>>, vector<3x3xf32>
    %cst_33 = arith.constant dense<0.000000e+00> : vector<16x3xf32>
    %49 = tpu.matmul %44, %48, %cst_33 {dimension_numbers = #tpu.dot_dimension_numbers<[1], [0], [0], [1], [0, 0, 1, 1], [], []>} : vector<16x3xf32>, vector<3x3xf32>, vector<16x3xf32> -> vector<16x3xf32>
    %50 = vector.broadcast %47 : vector<1x3xf32> to vector<16x3xf32>
    %51 = arith.addf %50, %49 : vector<16x3xf32>
    %52 = vector.extract_strided_slice %44 {offsets = [0, 0], sizes = [16, 1], strides = [1, 1]} : vector<16x3xf32> to vector<16x1xf32>
    %c0_34 = arith.constant 0 : index
    %c0_35 = arith.constant 0 : index
    %c0_36 = arith.constant 0 : index
    %53 = vector.load %arg16[%c0_34, %c0_35, %c0_36] : memref<3x3x3xf32, #tpu.memory_space<vmem>>, vector<1x3x3xf32>
    %54 = vector.shape_cast %53 : vector<1x3x3xf32> to vector<3x3xf32>
    %cst_37 = arith.constant dense<0.000000e+00> : vector<16x3xf32>
    %55 = tpu.matmul %44, %54, %cst_37 {dimension_numbers = #tpu.dot_dimension_numbers<[1], [0], [0], [1], [0, 0, 1, 1], [], []>} : vector<16x3xf32>, vector<3x3xf32>, vector<16x3xf32> -> vector<16x3xf32>
    %56 = vector.broadcast %52 : vector<16x1xf32> to vector<16x3xf32>
    %57 = arith.mulf %56, %55 : vector<16x3xf32>
    %58 = arith.addf %51, %57 : vector<16x3xf32>
    %59 = vector.extract_strided_slice %44 {offsets = [0, 1], sizes = [16, 1], strides = [1, 1]} : vector<16x3xf32> to vector<16x1xf32>
    %c1 = arith.constant 1 : index
    %c0_38 = arith.constant 0 : index
    %c0_39 = arith.constant 0 : index
    %60 = vector.load %arg16[%c1, %c0_38, %c0_39] : memref<3x3x3xf32, #tpu.memory_space<vmem>>, vector<1x3x3xf32>
    %61 = vector.shape_cast %60 : vector<1x3x3xf32> to vector<3x3xf32>
    %cst_40 = arith.constant dense<0.000000e+00> : vector<16x3xf32>
    %62 = tpu.matmul %44, %61, %cst_40 {dimension_numbers = #tpu.dot_dimension_numbers<[1], [0], [0], [1], [0, 0, 1, 1], [], []>} : vector<16x3xf32>, vector<3x3xf32>, vector<16x3xf32> -> vector<16x3xf32>
    %63 = vector.broadcast %59 : vector<16x1xf32> to vector<16x3xf32>
    %64 = arith.mulf %63, %62 : vector<16x3xf32>
    %65 = arith.addf %58, %64 : vector<16x3xf32>
    %66 = vector.extract_strided_slice %44 {offsets = [0, 2], sizes = [16, 1], strides = [1, 1]} : vector<16x3xf32> to vector<16x1xf32>
    %c2 = arith.constant 2 : index
    %c0_41 = arith.constant 0 : index
    %c0_42 = arith.constant 0 : index
    %67 = vector.load %arg16[%c2, %c0_41, %c0_42] : memref<3x3x3xf32, #tpu.memory_space<vmem>>, vector<1x3x3xf32>
    %68 = vector.shape_cast %67 : vector<1x3x3xf32> to vector<3x3xf32>
    %cst_43 = arith.constant dense<0.000000e+00> : vector<16x3xf32>
    %69 = tpu.matmul %44, %68, %cst_43 {dimension_numbers = #tpu.dot_dimension_numbers<[1], [0], [0], [1], [0, 0, 1, 1], [], []>} : vector<16x3xf32>, vector<3x3xf32>, vector<16x3xf32> -> vector<16x3xf32>
    %70 = vector.broadcast %66 : vector<16x1xf32> to vector<16x3xf32>
    %71 = arith.mulf %70, %69 : vector<16x3xf32>
    %72 = arith.addf %65, %71 : vector<16x3xf32>
    %73 = tpu.concatenate %44, %45, %72 in 0 : vector<16x3xf32>, vector<16x3xf32>, vector<16x3xf32> -> vector<48x3xf32>
    %cst_44 = arith.constant dense<0.000000e+00> : vector<48x32xf32>
    %74 = tpu.matmul %73, %11, %cst_44 {dimension_numbers = #tpu.dot_dimension_numbers<[1], [0], [0], [1], [0, 0, 1, 1], [], []>} : vector<48x3xf32>, vector<3x32xf32>, vector<48x32xf32> -> vector<48x32xf32>
    %75 = vector.extract_strided_slice %74 {offsets = [0, 0], sizes = [16, 32], strides = [1, 1]} : vector<48x32xf32> to vector<16x32xf32>
    %76 = vector.broadcast %12 : vector<1x32xf32> to vector<16x32xf32>
    %77 = arith.addf %75, %76 : vector<16x32xf32>
    %78 = vector.extract_strided_slice %74 {offsets = [16, 0], sizes = [16, 32], strides = [1, 1]} : vector<48x32xf32> to vector<16x32xf32>
    %79 = vector.extract_strided_slice %74 {offsets = [32, 0], sizes = [16, 32], strides = [1, 1]} : vector<48x32xf32> to vector<16x32xf32>
    %80 = arith.negf %77 : vector<16x32xf32>
    %81 = math.exp %80 : vector<16x32xf32>
    %cst_45 = arith.constant 1.000000e+00 : f32
    %82 = vector.broadcast %cst_45 : f32 to vector<16x32xf32>
    %83 = arith.addf %82, %81 : vector<16x32xf32>
    %84 = arith.divf %82, %83 : vector<16x32xf32>
    %cst_46 = arith.constant 1.000000e+00 : f32
    %85 = vector.broadcast %cst_46 : f32 to vector<16x32xf32>
    %86 = arith.subf %85, %84 : vector<16x32xf32>
    %87 = arith.mulf %84, %86 : vector<16x32xf32>
    %cst_47 = arith.constant 2.000000e+00 : f32
    %88 = vector.broadcast %cst_47 : f32 to vector<16x32xf32>
    %89 = arith.mulf %88, %84 : vector<16x32xf32>
    %cst_48 = arith.constant 1.000000e+00 : f32
    %90 = vector.broadcast %cst_48 : f32 to vector<16x32xf32>
    %91 = arith.subf %90, %89 : vector<16x32xf32>
    %92 = arith.mulf %87, %91 : vector<16x32xf32>
    %93 = arith.mulf %92, %78 : vector<16x32xf32>
    %94 = arith.mulf %93, %78 : vector<16x32xf32>
    %95 = arith.mulf %87, %79 : vector<16x32xf32>
    %96 = arith.addf %94, %95 : vector<16x32xf32>
    %97 = tpu.concatenate %84, %96 in 0 : vector<16x32xf32>, vector<16x32xf32> -> vector<32x32xf32>
    %cst_49 = arith.constant dense<0.000000e+00> : vector<32x16xf32>
    %98 = tpu.matmul %97, %13, %cst_49 {dimension_numbers = #tpu.dot_dimension_numbers<[1], [0], [0], [1], [0, 0, 1, 1], [], []>} : vector<32x32xf32>, vector<32x16xf32>, vector<32x16xf32> -> vector<32x16xf32>
    %99 = vector.extract_strided_slice %98 {offsets = [0, 0], sizes = [16, 16], strides = [1, 1]} : vector<32x16xf32> to vector<16x16xf32>
    %100 = vector.broadcast %14 : vector<1x16xf32> to vector<16x16xf32>
    %101 = arith.addf %99, %100 : vector<16x16xf32>
    %102 = vector.extract_strided_slice %98 {offsets = [16, 0], sizes = [16, 16], strides = [1, 1]} : vector<32x16xf32> to vector<16x16xf32>
    %c0_50 = arith.constant 0 : index
    %c0_51 = arith.constant 0 : index
    %103 = vector.load %arg20[%c0_50, %c0_51] : memref<1x16xf32, #tpu.memory_space<vmem>>, vector<1x16xf32>
    %104 = arith.subf %101, %3 : vector<16x16xf32>
    %105 = arith.mulf %104, %104 : vector<16x16xf32>
    %106 = vector.broadcast %6 : vector<16x1xf32> to vector<16x16xf32>
    %107 = arith.mulf %106, %105 : vector<16x16xf32>
    %cst_52 = arith.constant dense<0.000000e+00> : vector<16xf32>
    %108 = vector.multi_reduction <add>, %107, %cst_52 [0] : vector<16x16xf32> to vector<16xf32>
    %109 = vector.shape_cast %108 : vector<16xf32> to vector<1x16xf32>
    %110 = arith.addf %103, %109 : vector<1x16xf32>
    %c0_53 = arith.constant 0 : index
    %c0_54 = arith.constant 0 : index
    %111 = vector.load %arg20[%c0_53, %c0_54] : memref<1x16xf32, #tpu.memory_space<vmem>>, vector<1x16xf32>
    tpu.vector_store %arg20[%c0_53, %c0_54], %110 {strides = array<i32>} : memref<1x16xf32, #tpu.memory_space<vmem>>, vector<1x16xf32>,
    %c0_55 = arith.constant 0 : index
    %c0_56 = arith.constant 0 : index
    %112 = vector.load %arg21[%c0_55, %c0_56] : memref<1x16xf32, #tpu.memory_space<vmem>>, vector<1x16xf32>
    %113 = arith.subf %102, %5 : vector<16x16xf32>
    %114 = arith.mulf %113, %113 : vector<16x16xf32>
    %115 = vector.broadcast %6 : vector<16x1xf32> to vector<16x16xf32>
    %116 = arith.mulf %115, %114 : vector<16x16xf32>
    %cst_57 = arith.constant dense<0.000000e+00> : vector<16xf32>
    %117 = vector.multi_reduction <add>, %116, %cst_57 [0] : vector<16x16xf32> to vector<16xf32>
    %118 = vector.shape_cast %117 : vector<16xf32> to vector<1x16xf32>
    %119 = arith.addf %112, %118 : vector<1x16xf32>
    %c0_58 = arith.constant 0 : index
    %c0_59 = arith.constant 0 : index
    %120 = vector.load %arg21[%c0_58, %c0_59] : memref<1x16xf32, #tpu.memory_space<vmem>>, vector<1x16xf32>
    tpu.vector_store %arg21[%c0_58, %c0_59], %119 {strides = array<i32>} : memref<1x16xf32, #tpu.memory_space<vmem>>, vector<1x16xf32>,
    %c0_60 = arith.constant 0 : index
    %c0_61 = arith.constant 0 : index
    %121 = vector.load %arg22[%c0_60, %c0_61] : memref<1x3xf32, #tpu.memory_space<vmem>>, vector<1x3xf32>
    %122 = arith.subf %72, %46 : vector<16x3xf32>
    %123 = arith.mulf %122, %122 : vector<16x3xf32>
    %124 = vector.broadcast %6 : vector<16x1xf32> to vector<16x3xf32>
    %125 = arith.mulf %124, %123 : vector<16x3xf32>
    %cst_62 = arith.constant dense<0.000000e+00> : vector<3xf32>
    %126 = vector.multi_reduction <add>, %125, %cst_62 [0] : vector<16x3xf32> to vector<3xf32>
    %127 = vector.shape_cast %126 : vector<3xf32> to vector<1x3xf32>
    %128 = arith.addf %121, %127 : vector<1x3xf32>
    %c0_63 = arith.constant 0 : index
    %c0_64 = arith.constant 0 : index
    %129 = vector.load %arg22[%c0_63, %c0_64] : memref<1x3xf32, #tpu.memory_space<vmem>>, vector<1x3xf32>
    tpu.vector_store %arg22[%c0_63, %c0_64], %128 {strides = array<i32>} : memref<1x3xf32, #tpu.memory_space<vmem>>, vector<1x3xf32>,
    %c0_i32_65 = arith.constant 0 : i32
    %130 = arith.cmpi eq, %arg1, %c0_i32_65 : i32
    %131 = arith.extui %130 : i1 to i32
    %c0_i32_66 = arith.constant 0 : i32
    %132 = arith.cmpi ne, %131, %c0_i32_66 : i32
    scf.if %132 {
      %c0_67 = arith.constant 0 : index
      %c0_68 = arith.constant 0 : index
      %133 = vector.load %arg20[%c0_67, %c0_68] : memref<1x16xf32, #tpu.memory_space<vmem>>, vector<1x16xf32>
      %134 = vector.shape_cast %133 : vector<1x16xf32> to vector<1x1x16xf32>
      %c0_69 = arith.constant 0 : index
      %c0_70 = arith.constant 0 : index
      %c0_71 = arith.constant 0 : index
      %135 = vector.load %arg17[%c0_69, %c0_70, %c0_71] : memref<1x1x16xf32, #tpu.memory_space<vmem>>, vector<1x1x16xf32>
      tpu.vector_store %arg17[%c0_69, %c0_70, %c0_71], %134 {strides = array<i32>} : memref<1x1x16xf32, #tpu.memory_space<vmem>>, vector<1x1x16xf32>,
      %c0_72 = arith.constant 0 : index
      %c0_73 = arith.constant 0 : index
      %136 = vector.load %arg21[%c0_72, %c0_73] : memref<1x16xf32, #tpu.memory_space<vmem>>, vector<1x16xf32>
      %137 = vector.shape_cast %136 : vector<1x16xf32> to vector<1x1x16xf32>
      %c0_74 = arith.constant 0 : index
      %c0_75 = arith.constant 0 : index
      %c0_76 = arith.constant 0 : index
      %138 = vector.load %arg18[%c0_74, %c0_75, %c0_76] : memref<1x1x16xf32, #tpu.memory_space<vmem>>, vector<1x1x16xf32>
      tpu.vector_store %arg18[%c0_74, %c0_75, %c0_76], %137 {strides = array<i32>} : memref<1x1x16xf32, #tpu.memory_space<vmem>>, vector<1x1x16xf32>,
      %c0_77 = arith.constant 0 : index
      %c0_78 = arith.constant 0 : index
      %139 = vector.load %arg22[%c0_77, %c0_78] : memref<1x3xf32, #tpu.memory_space<vmem>>, vector<1x3xf32>
      %140 = vector.shape_cast %139 : vector<1x3xf32> to vector<1x1x3xf32>
      %c0_79 = arith.constant 0 : index
      %c0_80 = arith.constant 0 : index
      %c0_81 = arith.constant 0 : index
      %141 = vector.load %arg19[%c0_79, %c0_80, %c0_81] : memref<1x1x3xf32, #tpu.memory_space<vmem>>, vector<1x1x3xf32>
      tpu.vector_store %arg19[%c0_79, %c0_80, %c0_81], %140 {strides = array<i32>} : memref<1x1x3xf32, #tpu.memory_space<vmem>>, vector<1x1x3xf32>,
    } else {
    }
    return
  }
  func.func @transform_0(%arg0: i32, %arg1: i32) -> (i32, i32) {
    %c1_i32 = arith.constant 1 : i32
    %0 = arith.muli %arg0, %c1_i32 : i32
    %1 = arith.addi %0, %arg1 : i32
    %c0_i32 = arith.constant 0 : i32
    %c0_i32_0 = arith.constant 0 : i32
    return %1, %c0_i32 : i32, i32
  }
  func.func @transform_1(%arg0: i32, %arg1: i32) -> (i32, i32) {
    %c1_i32 = arith.constant 1 : i32
    %0 = arith.muli %arg0, %c1_i32 : i32
    %1 = arith.addi %0, %arg1 : i32
    %c0_i32 = arith.constant 0 : i32
    %c0_i32_0 = arith.constant 0 : i32
    return %1, %c0_i32 : i32, i32
  }
  func.func @transform_2(%arg0: i32, %arg1: i32) -> (i32, i32) {
    %c1_i32 = arith.constant 1 : i32
    %0 = arith.muli %arg0, %c1_i32 : i32
    %1 = arith.addi %0, %arg1 : i32
    %c0_i32 = arith.constant 0 : i32
    %c0_i32_0 = arith.constant 0 : i32
    return %1, %c0_i32 : i32, i32
  }
  func.func @transform_3(%arg0: i32, %arg1: i32) -> (i32, i32) {
    %c1_i32 = arith.constant 1 : i32
    %0 = arith.muli %arg0, %c1_i32 : i32
    %1 = arith.addi %0, %arg1 : i32
    %c0_i32 = arith.constant 0 : i32
    %c0_i32_0 = arith.constant 0 : i32
    return %1, %c0_i32 : i32, i32
  }
  func.func @transform_4(%arg0: i32, %arg1: i32) -> (i32, i32) {
    %c0_i32 = arith.constant 0 : i32
    %c0_i32_0 = arith.constant 0 : i32
    %c0_i32_1 = arith.constant 0 : i32
    return %c0_i32, %c0_i32_0 : i32, i32
  }
  func.func @transform_5(%arg0: i32, %arg1: i32) -> (i32, i32) {
    %c0_i32 = arith.constant 0 : i32
    %c0_i32_0 = arith.constant 0 : i32
    %c0_i32_1 = arith.constant 0 : i32
    return %c0_i32, %c0_i32_0 : i32, i32
  }
  func.func @transform_6(%arg0: i32, %arg1: i32) -> (i32, i32) {
    %c0_i32 = arith.constant 0 : i32
    %c0_i32_0 = arith.constant 0 : i32
    %c0_i32_1 = arith.constant 0 : i32
    return %c0_i32, %c0_i32_0 : i32, i32
  }
  func.func @transform_7(%arg0: i32, %arg1: i32) -> (i32, i32) {
    %c0_i32 = arith.constant 0 : i32
    %c0_i32_0 = arith.constant 0 : i32
    %c0_i32_1 = arith.constant 0 : i32
    return %c0_i32, %c0_i32_0 : i32, i32
  }
  func.func @transform_8(%arg0: i32, %arg1: i32) -> (i32, i32) {
    %c0_i32 = arith.constant 0 : i32
    %c0_i32_0 = arith.constant 0 : i32
    %c0_i32_1 = arith.constant 0 : i32
    return %c0_i32, %c0_i32_0 : i32, i32
  }
  func.func @transform_9(%arg0: i32, %arg1: i32) -> (i32, i32) {
    %c0_i32 = arith.constant 0 : i32
    %c0_i32_0 = arith.constant 0 : i32
    %c0_i32_1 = arith.constant 0 : i32
    return %c0_i32, %c0_i32_0 : i32, i32
  }
  func.func @transform_10(%arg0: i32, %arg1: i32) -> (i32, i32) {
    %c0_i32 = arith.constant 0 : i32
    %c0_i32_0 = arith.constant 0 : i32
    %c0_i32_1 = arith.constant 0 : i32
    return %c0_i32, %c0_i32_0 : i32, i32
  }
  func.func @transform_11(%arg0: i32, %arg1: i32) -> (i32, i32) {
    %c0_i32 = arith.constant 0 : i32
    %c0_i32_0 = arith.constant 0 : i32
    %c0_i32_1 = arith.constant 0 : i32
    return %c0_i32, %c0_i32_0 : i32, i32
  }
  func.func @transform_12(%arg0: i32, %arg1: i32) -> (i32, i32) {
    %c0_i32 = arith.constant 0 : i32
    %c0_i32_0 = arith.constant 0 : i32
    %c0_i32_1 = arith.constant 0 : i32
    return %c0_i32, %c0_i32_0 : i32, i32
  }
  func.func @transform_13(%arg0: i32, %arg1: i32) -> (i32, i32) {
    %c0_i32 = arith.constant 0 : i32
    %c0_i32_0 = arith.constant 0 : i32
    %c0_i32_1 = arith.constant 0 : i32
    return %c0_i32, %c0_i32_0 : i32, i32
  }
  func.func @transform_14(%arg0: i32, %arg1: i32) -> (i32, i32, i32) {
    %c0_i32 = arith.constant 0 : i32
    %c0_i32_0 = arith.constant 0 : i32
    %c0_i32_1 = arith.constant 0 : i32
    %c0_i32_2 = arith.constant 0 : i32
    return %c0_i32, %c0_i32_0, %c0_i32_1 : i32, i32, i32
  }
  func.func @transform_15(%arg0: i32, %arg1: i32) -> (i32, i32, i32) {
    %c0_i32 = arith.constant 0 : i32
    %c0_i32_0 = arith.constant 0 : i32
    %c0_i32_1 = arith.constant 0 : i32
    return %arg0, %c0_i32, %c0_i32_0 : i32, i32, i32
  }
  func.func @transform_16(%arg0: i32, %arg1: i32) -> (i32, i32, i32) {
    %c0_i32 = arith.constant 0 : i32
    %c0_i32_0 = arith.constant 0 : i32
    %c0_i32_1 = arith.constant 0 : i32
    return %arg0, %c0_i32, %c0_i32_0 : i32, i32, i32
  }
  func.func @transform_17(%arg0: i32, %arg1: i32) -> (i32, i32, i32) {
    %c0_i32 = arith.constant 0 : i32
    %c0_i32_0 = arith.constant 0 : i32
    %c0_i32_1 = arith.constant 0 : i32
    return %arg0, %c0_i32, %c0_i32_0 : i32, i32, i32
  }
}

</mosaic_0001>

<bundles_post_ra>
// kernel: mul.4
= control target key start
LH: loop header
LB: loop body
LE: loop exit
PB: predicated region body
PF: predicated region fallthrough
CT: control target
= control target key end

     0   :  { %s56_s0 = inlined_call_operand.vmem [shape: f32[10,3], index: 0, kind: input, shape index: {}]   ;;  %s57_s1 = inlined_call_operand.vmem [shape: f32[10,3], index: 1, kind: input, shape index: {}]   ;;  %s58_s2 = inlined_call_operand.vmem [shape: f32[10,3], index: 2, kind: output, shape index: {}]  }
   0x1   :  { %v3_v0 = vld [vmem:[%s56_s0] sm:$0xff]  ;;  %v20_v2 = vld [vmem:[%s56_s0 + $0x8] sm:$0xff] }
   0x2   :  { %v4_v1 = vld [vmem:[%s57_s1] sm:$0xff]  ;;  %v21_v4 = vld [vmem:[%s57_s1 + $0x8] sm:$0xff] }
   0x3   :  { %v7_v3 = vmul.f32 %v4_v1, %v3_v0  ;;  %v16_v5 = vmul.f32 %v21_v4, %v20_v2 }
   0x5   :  { %9 = vst [vmem:[%s58_s2] sm:$0xff] %v7_v3  ;;  %22 = vst [vmem:[%s58_s2 + $0x8] sm:$0xff] %v16_v5 }

// kernel: sindy_ae_o2_forward.1
= control target key start
LH: loop header
LB: loop body
LE: loop exit
PB: predicated region body
PF: predicated region fallthrough
CT: control target
= control target key end

     0   :  { %s2167_s24 = smov 0   ;;  %s2169_s25 = smov 0   ;;  %s2375_s0 = inlined_call_operand.vmem [shape: f32[32,16], index: 0, kind: input, shape index: {}]   ;;  %s2376_s1 = inlined_call_operand.vmem [shape: f32[32,16], index: 1, kind: input, shape index: {}]   ;;  %s2377_s2 = inlined_call_operand.vmem [shape: f32[32,16], index: 2, kind: input, shape index: {}]   ;;  %s2378_s3 = inlined_call_operand.vmem [shape: f32[32,1], index: 3, kind: input, shape index: {}]   ;;  %s2379_s4 = inlined_call_operand.vmem [shape: f32[16,32], index: 4, kind: input, shape index: {}]   ;;  %s2380_s5 = inlined_call_operand.vmem [shape: f32[1,32], index: 5, kind: input, shape index: {}]   ;;  %s2381_s6 = inlined_call_operand.vmem [shape: f32[32,3], index: 6, kind: input, shape index: {}]   ;;  %s2382_s7 = inlined_call_operand.vmem [shape: f32[1,3], index: 7, kind: input, shape index: {}]   ;;  %s2383_s8 = inlined_call_operand.vmem [shape: f32[3,32], index: 8, kind: input, shape index: {}]   ;;  %s2384_s9 = inlined_call_operand.vmem [shape: f32[1,32], index: 9, kind: input, shape index: {}]   ;;  %s2385_s10 = inlined_call_operand.vmem [shape: f32[32,16], index: 10, kind: input, shape index: {}]   ;;  %s2386_s11 = inlined_call_operand.vmem [shape: f32[1,16], index: 11, kind: input, shape index: {}]   ;;  %s2387_s12 = inlined_call_operand.vmem [shape: f32[1,3], index: 12, kind: input, shape index: {}]   ;;  %s2388_s13 = inlined_call_operand.vmem [shape: f32[3,3], index: 13, kind: input, shape index: {}]   ;;  %s2389_s14 = inlined_call_operand.vmem [shape: f32[3,3,3], index: 14, kind: input, shape index: {}]   ;;  %s2390_s15 = inlined_call_operand.vmem [shape: f32[2,1,16], index: 15, kind: output, shape index: {0}]   ;;  %s2391_s16 = inlined_call_operand.vmem [shape: f32[2,1,16], index: 16, kind: output, shape index: {1}]   ;;  %s2392_s17 = inlined_call_operand.vmem [shape: f32[2,1,3], index: 17, kind: output, shape index: {2}]  }
   0x1   :  { %2393 = sst [smem:[#allocation5_spill]] %s2375_s0  ;;  %s2171_s26 = smov 0  }
   0x2   :  { %2394 = sst [smem:[#allocation6_spill]] %s2376_s1 }
   0x3   :  { %2395 = sst [smem:[#allocation7_spill]] %s2379_s4 }
   0x4 LB: > { %s40_s27 = sadd.s32 1, %s2067_s25  ;;  %p1822_p0 = scmp.ge.s32.totalorder %s2071_s26, 1  ;;  %s2071_s26 = sphi %s2171_s26, %s28_s26   ;;  %s2067_s25 = sphi %s2169_s25, %s2400_s25   ;;  %s2063_s24 = sphi %s2167_s24, %s2399_s24  }
   0x5   : > { %p42_p1 = scmp.ge.s32.totalorder %s40_s27, 2  ;;  %p554_p2 = scmp.lt.s32.totalorder %s2071_s26, 3 }
   0x7   : > { %s2402_s27 = smov (%p42_p1, %s40_s27), 0  ;;  %p555_p3 = pnand %p1822_p0, %p554_p2 }
   0x8   : > { %s2396_s4 = sld [smem:[#allocation7_spill]] (!%p555_p3)  ;;  %s1823_s18 = sshll.u32 (!%p555_p3), %s2063_s24, 1 }
   0x9   : > { %558 = sbr.rel (%p555_p3) target bundleno = 1083 (0x43b), region = 80  ;;  %p631_p4 = scmp.lt.s32.totalorder (!%p555_p3), %s1823_s18, 3 }
   0xa   : > { %s2397_s21 = sld [smem:[#allocation5_spill]] (!%p555_p3)  ;;  %p661_p5 = scmp.lt.s32.totalorder (!%p555_p3), %s2063_s24, 1 }
   0xb   : > { %s2398_s29 = sld [smem:[#allocation6_spill]] (!%p555_p3) }
   0xe   : > { %v688_v0 = vld [vmem:[%s2396_s4 + $0x8] sm:$0xff]  ;;  %v687_v1 = vld [vmem:[%s2396_s4] sm:$0xff]  ;;  %s2404_s18 = smov (!%p631_p4, %s1823_s18), 3  ;;  %vm702_vm0 = vcmask 130048   ;;  %v693_v8 = vld [vmem:[%s2381_s6 + $0x18] sm:$0xff]  ;;  %vm987_vm1 = vcmask 1042432  }
   0xf   : > { %1924 = vmatprep.subr.mxu0 %v688_v0  ;;  %s2194_s19 = sshll.u32 %s2404_s18, 3  ;;  %v692_v9 = vld [vmem:[%s2381_s6 + $0x10] sm:$0xff]  ;;  %1937 = vmatprep.subr.mxu1 %v693_v8  ;;  %v691_v10 = vld [vmem:[%s2381_s6 + $0x8] sm:$0xff]  ;;  %v690_v11 = vld [vmem:[%s2381_s6] sm:$0xff]  ;;  %vm856_vm2 = vcmask 261120   ;;  %v2073_v51 = vmov 1  }
  0x10   : > { %1925 = vmatpush3.msra.mxu0 %v688_v0  ;;  %s634_s22 = scalar_lea.vmem %s2397_s21, %s2194_s19  ;;  %s650_s4 = scalar_lea.vmem %s2377_s2, %s2194_s19  ;;  %1938 = vmatpush3.msra.mxu1 %v693_v8  ;;  %v979_v12 = vld [vmem:[%s2388_s13] sm:$0x7]  ;;  %v1854_v13 = vld [vmem:[%s2389_s14 + $0x4] sm:$0x7]  ;;  %v2074_v52 = vmov 0   ;;  %vm980_vm3 = vcmask 23552  }
  0x11   : > { %1926 = vmatprep.subr.mxu0 %v687_v1  ;;  %s642_s0 = scalar_lea.vmem %s2398_s29, %s2194_s19  ;;  %v2204_v2 = vld [vmem:[%s634_s22] sm:$0xff]  ;;  %v2206_v3 = vld [vmem:[%s634_s22 + $0x8] sm:$0xff]  ;;  %1939 = vmatprep.subr.mxu1 %v692_v9  ;;  %v2075_v63 = vmov 2   ;;  %s658_s21 = scalar_lea.vmem %s2378_s3, %s2194_s19  ;;  %vm677_vm4 = vcmask 16384   ;;  %v699_v8 = vld [vmem:[%s2385_s10 + $0x10] sm:$0xff]  ;;  %vm674_vm5 = vcmask 122880  }
  0x12   : > { %1927 = vmatpush3.msra.mxu0 %v687_v1  ;;  %v681_v4 = vld [vmem:[%s642_s0] sm:$0xff]  ;;  %1928 = vmatprep.mubr.msk.f32.mxu0 %vm702_vm0, %v2204_v2  ;;  %v682_v5 = vld [vmem:[%s642_s0 + $0x8] sm:$0xff]  ;;  %s2406_s24 = smov (!%p661_p5, %s2063_s24), 1 }
  0x13   : > { %1929 = vmatmul.mubr.msk.f32.vlgmr.msra.gmra.mxu0 %vm702_vm0, %v2206_v3  ;;  %v2217_v6 = vld [vmem:[%s650_s4] sm:$0xff]  ;;  %v2222_v7 = vld [vmem:[%s650_s4 + $0x8] sm:$0xff]  ;;  %1940 = vmatpush3.msra.mxu1 %v692_v9  ;;  %s669_s19 = scalar_lea.vmem %s2392_s17, %s2406_s24  ;;  %s663_s30 = scalar_lea.vmem %s2390_s15, %s2406_s24 }
  0x14   : > { %1931 = vmatprep.mubr.msk.f32.mxu0 %vm702_vm0, %v681_v4  ;;  %1941 = vmatprep.subr.mxu1 %v691_v10  ;;  %v1837_v14 = vld [vmem:[%s2380_s5] ss:$0 sm:$0xff]  ;;  %v1858_v60 = vld [vmem:[%s2389_s14 + $0x8] sm:$0x7]  ;;  %v2076_v4 = vmov 0.0   ;;  %s666_s20 = scalar_lea.vmem %s2391_s16, %s2406_s24 }
  0x15   : > { %1942 = vmatpush3.msra.mxu1 %v691_v10  ;;  %1954 = vmatprep.subr.msk.mxu0 %vm987_vm1, %v979_v12  ;;  %v1074_v53 = vld [vmem:[%s2389_s14] sm:$0x7]  ;;  %v686_v0 = vld [vmem:[%s658_s21 + $0x8] sm:$0xff]  ;;  %678 = vst.msk [vmem:[#allocation4] sm:$0x1] %vm677_vm4, %v2076_v4 }
  0x16   : > { %1943 = vmatprep.subr.mxu1 %v690_v11  ;;  %1955 = vmatpush3.msk.msra.mxu0 %vm987_vm1, %v979_v12  ;;  %v695_v54 = vld [vmem:[%s2383_s8] sm:$0x7]  ;;  %v698_v9 = vld [vmem:[%s2385_s10 + $0x8] sm:$0xff]  ;;  %675 = vst.msk [vmem:[#allocation2] sm:$0x1] %vm674_vm5, %v2076_v4 }
  0x17   : > { %1932 = vmatmul.mubr.msk.f32.gmra.mxu0 %vm702_vm0, %v682_v5  ;;  %1944 = vmatpush3.msra.mxu1 %v690_v11  ;;  %v1846_v55 = vld [vmem:[%s2382_s7] ss:$0 sm:$0xff]  ;;  %v700_v5 = vld [vmem:[%s2385_s10 + $0x18] sm:$0xff]  ;;  %676 = vst.msk [vmem:[#allocation3] sm:$0x1] %vm674_vm5, %v2076_v4 }
  0x18   : > { %1934 = vmatprep.mubr.msk.f32.mxu0 %vm702_vm0, %v2217_v6  ;;  %1964 = vmatprep.subr.msk.mxu1 %vm987_vm1, %v1854_v13  ;;  %v685_v1 = vld [vmem:[%s658_s21] sm:$0xff] }
  0x19   : > { %2028 = vset.pattern.permute.xlu1 %v2073_v51  ;;  %2027 = vset.pattern.permute.xlu0 %v2074_v52  ;;  %v697_v10 = vld [vmem:[%s2385_s10] sm:$0xff] }
  0x1a   : > { %1959 = vmatprep.subr.msk.mxu0 %vm987_vm1, %v1074_v53 }
  0x1b   : > { %1935 = vmatmul.mubr.msk.f32.gmra.mxu0 %vm702_vm0, %v2222_v7 }
  0xd3   : > { %v1930_v15 = vpop.f32.mrf.mxu0 }
  0xd4   : > { %v823_v16 = vadd.f32 %v1930_v15, %v1837_v14 }
  0xd5   : > { %v787_v17 = vpop.f32.mrf.mxu0 }
  0xd6   : > { %v1839_v18 = vmul.f32 -1.442695, %v823_v16  ;;  %v822_v19 = vadd.f32 %v1837_v14, %v787_v17  ;;  %v1850_v17 = vld [vmem:[%s2387_s12] ss:$0 sm:$0xff] }
  0xd7   : > { %v1933_v25 = vpop.f32.mrf.mxu0 }
  0xd8   : > { %2033 = vpow2.f32 %v1839_v18  ;;  %v1838_v20 = vmul.f32 -1.442695, %v822_v19 }
  0xd9   : > { %v797_v27 = vpop.f32.mrf.mxu0 }
  0xda   : > { %2035 = vpow2.f32 %v1838_v20 }
  0xdb   : > { %v1936_v35 = vpop.f32.mrf.mxu0 }
  0xdd   : > { %v807_v43 = vpop.f32.mrf.mxu0 }
  0xe5   : > { %v2034_v21 = vpop.eup %2033 }
  0xe6   : > { %v831_v22 = vadd.f32 1.0, %v2034_v21  ;;  %v1869_v21 = vld [vmem:[%s2384_s9] ss:$0 sm:$0xff] }
  0xe7   : > { %v2036_v23 = vpop.eup %2035 }
  0xe8   : > { %2037 = vrcp.f32 %v831_v22  ;;  %v830_v24 = vadd.f32 1.0, %v2036_v23 }
  0xea   : > { %2039 = vrcp.f32 %v830_v24 }
  0xf5   : > { %v2038_v26 = vpop.eup %2037 }
  0xf6   : > { %v837_v28 = vsub.f32 1.0, %v2038_v26  ;;  %v841_v29 = vmul.f32 2.0, %v2038_v26 }
  0xf7   : > { %v2040_v30 = vpop.eup %2039 }
  0xf8   : > { %v839_v31 = vmul.f32 %v2038_v26, %v837_v28  ;;  %v843_v32 = vsub.f32 1.0, %v841_v29  ;;  %v836_v33 = vsub.f32 1.0, %v2040_v30  ;;  %v840_v34 = vmul.f32 2.0, %v2040_v30  ;;  %1945 = vmatprep.mubr.msk.f32.mxu1 %vm856_vm2, %v2040_v30 }
  0xf9   : > { %1946 = vmatmul.mubr.msk.f32.vlgmr.msra.gmra.mxu1 %vm856_vm2, %v2038_v26 }
  0xfa   : > { %v845_v36 = vmul.f32 %v843_v32, %v839_v31  ;;  %v838_v37 = vmul.f32 %v2040_v30, %v836_v33  ;;  %v842_v38 = vsub.f32 1.0, %v840_v34  ;;  %1965 = vmatpush3.msk.msra.mxu1 %vm987_vm1, %v1854_v13  ;;  %v847_v42 = vmul.f32 %v1933_v25, %v839_v31 }
  0xfb   : > { %v853_v48 = vmul.f32 %v1936_v35, %v839_v31  ;;  %1974 = vmatprep.subr.msk.mxu1 %vm987_vm1, %v695_v54 }
  0xfc   : > { %v849_v39 = vmul.f32 %v1933_v25, %v845_v36  ;;  %v844_v40 = vmul.f32 %v842_v38, %v838_v37  ;;  %v846_v41 = vmul.f32 %v838_v37, %v797_v27  ;;  %v852_v47 = vmul.f32 %v838_v37, %v807_v43 }
  0xfe   : > { %v848_v44 = vmul.f32 %v844_v40, %v797_v27  ;;  %1948 = vmatprep.mubr.msk.f32.mxu1 %vm856_vm2, %v846_v41  ;;  %v851_v45 = vmul.f32 %v1933_v25, %v849_v39 }
  0xff   : > { %1949 = vmatmul.mubr.msk.f32.gmra.mxu1 %vm856_vm2, %v847_v42 }
 0x100   : > { %v850_v46 = vmul.f32 %v848_v44, %v797_v27  ;;  %v855_v50 = vadd.f32 %v853_v48, %v851_v45 }
 0x102   : > { %v854_v49 = vadd.f32 %v852_v47, %v850_v46 }
 0x104   : > { %1951 = vmatprep.mubr.msk.f32.mxu1 %vm856_vm2, %v854_v49 }
 0x105   : > { %1952 = vmatmul.mubr.msk.f32.gmra.mxu1 %vm856_vm2, %v855_v50 }
 0x1b9   : > { %v1947_v56 = vpop.f32.mrf.mxu1 }
 0x1ba   : > { %v977_v57 = vadd.f32 %v1947_v56, %v1846_v55 }
 0x1bb   : > { %v941_v58 = vpop.f32.mrf.mxu1 }
 0x1bc   : > { %v976_v59 = vadd.f32 %v1846_v55, %v941_v58  ;;  %1250 = vperm.xlu1 %2028, %v977_v57   ;;  %1158 = vperm.xlu0 %2027, %v977_v57  }
 0x1be   : > { %1956 = vmatprep.mubr.msk.f32.mxu0 %vm980_vm3, %v976_v59  ;;  %1966 = vmatprep.mubr.msk.f32.mxu1 %vm980_vm3, %v976_v59 }
 0x1bf   : > { %1957 = vmatmul.mubr.msk.f32.vlgmr.msra.gmra.mxu0 %vm980_vm3, %v977_v57  ;;  %1967 = vmatmul.mubr.msk.f32.vlgmr.msra.gmra.mxu1 %vm980_vm3, %v977_v57  ;;  %v1950_v61 = vpop.f32.mrf.mxu1 }
 0x1c0   : > { %1960 = vmatpush3.msk.msra.mxu0 %vm987_vm1, %v1074_v53  ;;  %1246 = vperm.xlu1 %2028, %v976_v59  }
 0x1c1   : > { %1154 = vperm.xlu0 %2027, %v976_v59   ;;  %1961 = vmatprep.mubr.msk.f32.mxu0 %vm980_vm3, %v976_v59  ;;  %v951_v62 = vpop.f32.mrf.mxu1 }
 0x1c2   : > { %1976 = vmatprep.mubr.msk.f32.mxu1 %vm980_vm3, %v976_v59  ;;  %1969 = vmatprep.subr.msk.mxu0 %vm987_vm1, %v1858_v60 }
 0x1c3   : > { %1975 = vmatpush3.msk.msra.mxu1 %vm987_vm1, %v695_v54  ;;  %1962 = vmatmul.mubr.msk.f32.vlgmr.msra.gmra.mxu0 %vm980_vm3, %v977_v57 }
 0x1c4   : > { %1970 = vmatpush3.msk.msra.mxu0 %vm987_vm1, %v1858_v60  ;;  %1977 = vmatmul.mubr.msk.f32.vlgmr.msra.gmra.mxu1 %vm980_vm3, %v977_v57 }
 0x1c5   : > { %2030 = vset.pattern.permute.xlu1 %v2075_v63  ;;  %2029 = vset.pattern.permute.xlu0 %v2075_v63  ;;  %v1953_v11 = vpop.f32.mrf.mxu1 }
 0x1c6   : > { %1971 = vmatprep.mubr.msk.f32.mxu0 %vm980_vm3, %v976_v59  ;;  %1979 = vmatprep.mubr.msk.f32.mxu1 %vm980_vm3, %v951_v62 }
 0x1c7   : > { %1342 = vperm.xlu1 %2030, %v977_v57   ;;  %1338 = vperm.xlu0 %2029, %v976_v59   ;;  %v961_v13 = vpop.f32.mrf.mxu1 }
 0x1c8   : > { %1972 = vmatmul.mubr.msk.f32.vlgmr.msra.gmra.mxu0 %vm980_vm3, %v977_v57  ;;  %1980 = vmatmul.mubr.msk.f32.gmra.mxu1 %vm980_vm3, %v1950_v61 }
 0x1c9   : > { %1985 = vmatprep.subr.mxu0 %v700_v5 }
 0x1ca   : > { %1986 = vmatpush3.msra.mxu0 %v700_v5 }
 0x1cb   : > { %2032 = vset.pattern.permute.xlu0 %v2074_v52  ;;  %2031 = vset.pattern.permute.xlu1 %v2074_v52 }
 0x1cc   : > { %1614 = vperm.xlu0 %2032, %v686_v0   ;;  %1609 = vperm.xlu1 %2031, %v685_v1  }
 0x1cd   : > { %1987 = vmatprep.subr.mxu0 %v699_v8 }
 0x1ce   : > { %1988 = vmatpush3.msra.mxu0 %v699_v8 }
 0x1cf   : > { %1989 = vmatprep.subr.mxu0 %v698_v9 }
 0x1d0   : > { %1990 = vmatpush3.msra.mxu0 %v698_v9 }
 0x1d1   : > { %1991 = vmatprep.subr.mxu0 %v697_v10 }
 0x1d2   : > { %1992 = vmatpush3.msra.mxu0 %v697_v10  ;;  %v1649_v10 = vld [vmem:[#allocation4] sm:$0x1] }
 0x237   : > { %v1251_v12 = vpop.permute.xlu1 %1250  ;;  %v1159_v14 = vpop.permute.xlu0 %1158 }
 0x23b   : > { %v1247_v20 = vpop.permute.xlu1 %1246 }
 0x23c   : > { %v1155_v23 = vpop.permute.xlu0 %1154 }
 0x242   : > { %v1343_v36 = vpop.permute.xlu1 %1342  ;;  %v1339_v43 = vpop.permute.xlu0 %1338 }
 0x247   : > { %v2311_v50 = vpop.permute.xlu0 %1614  ;;  %v2315_v53 = vpop.permute.xlu1 %1609 }
 0x27f   : > { %v1958_v15 = vpop.f32.mrf.mxu0  ;;  %v1968_v16 = vpop.f32.mrf.mxu1 }
 0x280   : > { %v1073_v24 = vadd.f32 %v1958_v15, %v1850_v17  ;;  %v1254_v29 = vmul.f32 %v1968_v16, %v1251_v12 }
 0x281   : > { %v1057_v18 = vpop.f32.mrf.mxu0  ;;  %v1236_v19 = vpop.f32.mrf.mxu1 }
 0x282   : > { %v1072_v30 = vadd.f32 %v1850_v17, %v1057_v18  ;;  %v1253_v37 = vmul.f32 %v1247_v20, %v1236_v19 }
 0x283   : > { %v1963_v22 = vpop.f32.mrf.mxu0 }
 0x284   : > { %v1162_v25 = vmul.f32 %v1963_v22, %v1159_v14  ;;  %v1978_v26 = vpop.f32.mrf.mxu1 }
 0x285   : > { %v1466_v27 = vadd.f32 %v1978_v26, %v1869_v21  ;;  %v1144_v28 = vpop.f32.mrf.mxu0 }
 0x286   : > { %v1164_v31 = vadd.f32 %v1162_v25, %v1073_v24  ;;  %v1161_v32 = vmul.f32 %v1155_v23, %v1144_v28  ;;  %v1430_v33 = vpop.f32.mrf.mxu1 }
 0x287   : > { %v1871_v34 = vmul.f32 -1.442695, %v1466_v27  ;;  %v1465_v35 = vadd.f32 %v1869_v21, %v1430_v33 }
 0x288   : > { %v1163_v38 = vadd.f32 %v1161_v32, %v1072_v30  ;;  %v1256_v39 = vadd.f32 %v1254_v29, %v1164_v31  ;;  %v1973_v40 = vpop.f32.mrf.mxu0  ;;  %v1981_v24 = vpop.f32.mrf.mxu1 }
 0x289   : > { %2041 = vpow2.f32 %v1871_v34  ;;  %v1870_v41 = vmul.f32 -1.442695, %v1465_v35  ;;  %v1346_v42 = vmul.f32 %v1973_v40, %v1343_v36 }
 0x28a   : > { %v1255_v44 = vadd.f32 %v1253_v37, %v1163_v38  ;;  %v1328_v45 = vpop.f32.mrf.mxu0  ;;  %v1440_v27 = vpop.f32.mrf.mxu1  ;;  %v1876_v37 = vld [vmem:[%s2386_s11] ss:$0 sm:$0xff] }
 0x28b   : > { %2043 = vpow2.f32 %v1870_v41  ;;  %v1348_v46 = vadd.f32 %v1346_v42, %v1256_v39  ;;  %v1345_v47 = vmul.f32 %v1339_v43, %v1328_v45 }
 0x28d   : > { %v1347_v48 = vadd.f32 %v1345_v47, %v1255_v44  ;;  %v1651_v49 = vsub.f32 %v1348_v46, %v1953_v11 }
 0x28f   : > { %1982 = vmatprep.mubr.msk.f32.mxu1 %vm980_vm3, %v1347_v48  ;;  %v1653_v51 = vmul.f32 %v1651_v49, %v1651_v49  ;;  %v1650_v52 = vsub.f32 %v1347_v48, %v961_v13 }
 0x290   : > { %1983 = vmatmul.mubr.msk.f32.gmra.mxu1 %vm980_vm3, %v1348_v46 }
 0x291   : > { %v1655_v54 = vmul.f32 %v1653_v51, %v2311_v50  ;;  %v1652_v55 = vmul.f32 %v1650_v52, %v1650_v52 }
 0x293   : > { %v1654_v56 = vmul.f32 %v1652_v55, %v2315_v53  ;;  %v1657_v57 = vsel %vm980_vm3, %v1655_v54, 0.0 }
 0x295   : > { %v1656_v58 = vsel %vm980_vm3, %v1654_v56, 0.0 }
 0x296   : > { %v2042_v59 = vpop.eup %2041  ;;  %v1658_v60 = vadd.f32 %v1657_v57, %v1656_v58  ;;  %v1602_v57 = vld [vmem:[#allocation2] sm:$0x1] }
 0x297   : > { %v1474_v62 = vadd.f32 1.0, %v2042_v59 }
 0x298   : > { %v2044_v61 = vpop.eup %2043  ;;  %v1659_v63 = vrot.slane %v1658_v60, 4 }
 0x299   : > { %v1473_v0 = vadd.f32 1.0, %v2044_v61 }
 0x29a   : > { %v1660_v1 = vadd.f32 %v1659_v63, %v1658_v60 }
 0x29b   : > { %2045 = vrcp.f32 %v1473_v0 }
 0x29c   : > { %2047 = vrcp.f32 %v1474_v62  ;;  %v1661_v5 = vrot.slane %v1660_v1, 2 }
 0x29e   : > { %v1662_v8 = vadd.f32 %v1661_v5, %v1660_v1 }
 0x2a0   : > { %v1663_v9 = vrot.slane %v1662_v8, 1 }
 0x2a2   : > { %v1664_v11 = vadd.f32 %v1663_v9, %v1662_v8 }
 0x2a4   : > { %v1665_v12 = vadd.f32 %v1664_v11, %v1649_v10 }
 0x2a6   : > { %1667 = vst.msk [vmem:[#allocation4] sm:$0x1] %vm677_vm4, %v1665_v12 }
 0x2a8   : > { %v2046_v13 = vpop.eup %2045 }
 0x2a9   : > { %v2048_v14 = vpop.eup %2047  ;;  %1993 = vmatprep.mubr.msk.f32.mxu0 %vm856_vm2, %v2046_v13  ;;  %v1479_v16 = vsub.f32 1.0, %v2046_v13  ;;  %v1483_v17 = vmul.f32 2.0, %v2046_v13 }
 0x2aa   : > { %1994 = vmatmul.mubr.msk.f32.vlgmr.msra.gmra.mxu0 %vm856_vm2, %v2048_v14  ;;  %v1480_v18 = vsub.f32 1.0, %v2048_v14  ;;  %v1484_v19 = vmul.f32 2.0, %v2048_v14 }
 0x2ab   : > { %v1481_v20 = vmul.f32 %v2046_v13, %v1479_v16  ;;  %v1485_v21 = vsub.f32 1.0, %v1483_v17  ;;  %v1631_v16 = vld [vmem:[#allocation3] sm:$0x1] }
 0x2ac   : > { %v1482_v22 = vmul.f32 %v2048_v14, %v1480_v18  ;;  %v1486_v23 = vsub.f32 1.0, %v1484_v19 }
 0x2ad   : > { %v1675_v15 = vld [vmem:[#allocation4] sm:$0x1]  ;;  %v1487_v25 = vmul.f32 %v1485_v21, %v1481_v20 }
 0x2ae   : > { %1676 = vst.msk [vmem:[%s669_s19] sm:$0x1] %vm677_vm4, %v1675_v15  ;;  %v1488_v26 = vmul.f32 %v1486_v23, %v1482_v22 }
 0x2af   : > { %v1489_v28 = vmul.f32 %v1487_v25, %v1440_v27 }
 0x2b0   : > { %v1490_v29 = vmul.f32 %v1981_v24, %v1488_v26 }
 0x2b1   : > { %v1491_v33 = vmul.f32 %v1489_v28, %v1440_v27 }
 0x2b2   : > { %v1492_v4 = vmul.f32 %v1981_v24, %v1490_v29 }
 0x350   : > { %v1984_v30 = vpop.f32.mrf.mxu1 }
 0x351   : > { %v1494_v31 = vmul.f32 %v1984_v30, %v1482_v22 }
 0x352   : > { %v1450_v32 = vpop.f32.mrf.mxu1 }
 0x353   : > { %v1493_v34 = vmul.f32 %v1481_v20, %v1450_v32  ;;  %v1496_v36 = vadd.f32 %v1494_v31, %v1492_v4 }
 0x355   : > { %v1495_v35 = vadd.f32 %v1493_v34, %v1491_v33 }
 0x357   : > { %1996 = vmatprep.mubr.msk.f32.mxu0 %vm856_vm2, %v1495_v35 }
 0x358   : > { %1997 = vmatmul.mubr.msk.f32.gmra.mxu0 %vm856_vm2, %v1496_v36 }
 0x36a   : > { %v1995_v38 = vpop.f32.mrf.mxu0 }
 0x36b   : > { %v1601_v39 = vadd.f32 %v1995_v38, %v1876_v37 }
 0x36c   : > { %v1575_v40 = vpop.f32.mrf.mxu0 }
 0x36d   : > { %v1604_v41 = vsub.f32 %v1601_v39, %v2206_v3  ;;  %v1600_v42 = vadd.f32 %v1876_v37, %v1575_v40 }
 0x36f   : > { %v1606_v43 = vmul.f32 %v1604_v41, %v1604_v41  ;;  %v1603_v44 = vsub.f32 %v1600_v42, %v2204_v2 }
 0x371   : > { %v1618_v45 = vmul.f32 %v2311_v50, %v1606_v43  ;;  %v1605_v46 = vmul.f32 %v1603_v44, %v1603_v44 }
 0x373   : > { %v1617_v47 = vmul.f32 %v2315_v53, %v1605_v46  ;;  %v1620_v48 = vsel %vm702_vm0, %v1618_v45, 0.0 }
 0x375   : > { %v1619_v49 = vsel %vm702_vm0, %v1617_v47, 0.0 }
 0x376   : > { %v1621_v51 = vadd.f32 %v1620_v48, %v1619_v49 }
 0x378   : > { %v1622_v52 = vrot.slane %v1621_v51, 4 }
 0x37a   : > { %v1623_v54 = vadd.f32 %v1622_v52, %v1621_v51 }
 0x37c   : > { %v1624_v55 = vrot.slane %v1623_v54, 2 }
 0x37e   : > { %v1625_v56 = vadd.f32 %v1624_v55, %v1623_v54 }
 0x380   : > { %v1626_v3 = vrot.slane %v1625_v56, 1 }
 0x382   : > { %v1627_v58 = vadd.f32 %v1626_v3, %v1625_v56 }
 0x384   : > { %v1628_v59 = vadd.f32 %v1627_v58, %v1602_v57 }
 0x386   : > { %1630 = vst.msk [vmem:[#allocation2] sm:$0x1] %vm674_vm5, %v1628_v59 }
 0x38d   : > { %v1671_v2 = vld [vmem:[#allocation2] sm:$0x1] }
 0x38e   : > { %1672 = vst.msk [vmem:[%s663_s30] sm:$0x1] %vm674_vm5, %v1671_v2 }
 0x418   : > { %v1998_v60 = vpop.f32.mrf.mxu0 }
 0x419   : > { %v1633_v61 = vsub.f32 %v1998_v60, %v2222_v7 }
 0x41a   : > { %v1585_v62 = vpop.f32.mrf.mxu0 }
 0x41b   : > { %v1635_v63 = vmul.f32 %v1633_v61, %v1633_v61  ;;  %v1632_v0 = vsub.f32 %v1585_v62, %v2217_v6 }
 0x41d   : > { %v1637_v1 = vmul.f32 %v1635_v63, %v2311_v50  ;;  %v1634_v5 = vmul.f32 %v1632_v0, %v1632_v0 }
 0x41f   : > { %v1636_v8 = vmul.f32 %v1634_v5, %v2315_v53  ;;  %v1639_v9 = vsel %vm702_vm0, %v1637_v1, 0.0 }
 0x421   : > { %v1638_v10 = vsel %vm702_vm0, %v1636_v8, 0.0 }
 0x422   : > { %v1640_v11 = vadd.f32 %v1639_v9, %v1638_v10 }
 0x424   : > { %v1641_v12 = vrot.slane %v1640_v11, 4 }
 0x426   : > { %v1642_v13 = vadd.f32 %v1641_v12, %v1640_v11 }
 0x428   : > { %v1643_v14 = vrot.slane %v1642_v13, 2 }
 0x42a   : > { %v1644_v15 = vadd.f32 %v1643_v14, %v1642_v13 }
 0x42c   : > { %v1645_v7 = vrot.slane %v1644_v15, 1 }
 0x42e   : > { %v1646_v17 = vadd.f32 %v1645_v7, %v1644_v15 }
 0x430   : > { %v1647_v18 = vadd.f32 %v1646_v17, %v1631_v16 }
 0x432   : > { %1648 = vst.msk [vmem:[#allocation3] sm:$0x1] %vm674_vm5, %v1647_v18 }
 0x439   : > { %v1673_v6 = vld [vmem:[#allocation3] sm:$0x1] }
 0x43a   : > { %1674 = vst.msk [vmem:[%s666_s20] sm:$0x1] %vm674_vm5, %v1673_v6 }
 0x43b PF: > { %s28_s26 = sadd.s32 1, %s2071_s26   ;;  %s2399_s24 = smov %s2067_s25 }
 0x43c   : > { %p25_p6 = scmp.ge.s32.totalorder %s28_s26, 4   ;;  %s2400_s25 = smov %s2402_s27 }
 0x43e   :  { %27 = sbr.rel (!%p25_p6) target bundleno = 4 (0x4), region = 153 }

</bundles_post_ra>
